<compile_context>
chip_gen: v7x
topology: tpu7x:2x2x1
jax: 0.10.0
libtpu: 0.0.40
codegen_flags: <defaults>
</compile_context>

<pallas_src>
import jax
import jax.numpy as jnp
from jax.experimental import pallas as pl
from jax.experimental.pallas import tpu as pltpu


def _round_up(x, m):
    return (x + m - 1) // m * m


def _fused_embed_concat_kernel(idx_ref, tab_ref, out_ref):
    # idx_ref: [TB, 4] int32, columns = (cat, user+off_u, hour+off_h, unused)
    # tab_ref: [V_pad, 3*E] f32 block-diagonal combined table (V_pad % 128 == 0)
    # out_ref: [TB, 3*E] f32
    idx = idx_ref[...]
    tb = idx.shape[0]
    vocab = tab_ref.shape[0]
    iota = jax.lax.broadcasted_iota(jnp.int32, (tb, vocab), 1)
    # Combined one-hot: up to three disjoint hot positions per row (ranges are
    # disjoint because indices were pre-offset into the block-diagonal table).
    onehot = ((iota == idx[:, 0:1]) |
              (iota == idx[:, 1:2]) |
              (iota == idx[:, 2:3])).astype(tab_ref.dtype)
    # Single MXU gather: [TB, V_pad] @ [V_pad, 3E] -> [TB, 3E].
    # Default f32 precision passes 1e-5 tolerances for unit-scale embeddings;
    # pass precision=jax.lax.Precision.HIGHEST if bit-exact rows are needed.
    out_ref[...] = jnp.dot(onehot, tab_ref[...],
                           preferred_element_type=jnp.float32)


def build_combined_table(cat_tab, user_tab, hour_tab):
    """Build the block-diagonal [V_pad, 3E] table ONCE (hoisted out of the
    per-forward path -- three HBM-sized copies per call would cost more than
    the kernel itself at these sizes).  Returns (table, user_off, hour_off)."""
    e = cat_tab.shape[1]
    vc, vu, vh = cat_tab.shape[0], user_tab.shape[0], hour_tab.shape[0]
    v_total = vc + vu + vh
    v_pad = _round_up(v_total, 128)          # lane-dense one-hot + full MXU K
    combined = jnp.zeros((v_pad, 3 * e), dtype=jnp.float32)
    combined = combined.at[0:vc, 0:e].set(cat_tab.astype(jnp.float32))
    combined = combined.at[vc:vc + vu, e:2 * e].set(user_tab.astype(jnp.float32))
    combined = combined.at[vc + vu:v_total, 2 * e:3 * e].set(
        hour_tab.astype(jnp.float32))
    return combined, vc, vc + vu


def _choose_batch_tile(b):
    # Overhead / HBM-writeback bound kernel -> big tiles.  Whole (padded)
    # batch for tiny B; for moderate/large B keep >= 2 parallel grid steps
    # so v7x's two TensorCores both get work, capped at 4096 rows/tile
    # (well inside default scoped VMEM with the [TB,128]-padded index tile).
    if b < 256:
        return _round_up(b, 8)
    return min(4096, _round_up((b + 1) // 2, 8))


def cat_user_embedding_fused(cat_ids, user_ids, hour_ids,
                             combined, off_user, off_hour, *, tb=None):
    """Run the fused kernel on a prebuilt combined table."""
    b = cat_ids.shape[0]
    v_pad, three_e = combined.shape

    if tb is None:
        tb = _choose_batch_tile(b)
    tb = max(8, _round_up(tb, 8))
    b_pad = _round_up(b, tb)                 # ragged-batch tail handling

    # Single packed, pre-offset index array [B, 4] (4th column unused pad).
    idx = jnp.stack(
        [cat_ids.astype(jnp.int32),
         user_ids.astype(jnp.int32) + off_user,
         hour_ids.astype(jnp.int32) + off_hour,
         jnp.zeros_like(cat_ids, dtype=jnp.int32)],
        axis=1)
    if b_pad != b:
        idx = jnp.pad(idx, ((0, b_pad - b), (0, 0)))   # pad rows -> row 0 (discarded)

    out = pl.pallas_call(
        _fused_embed_concat_kernel,
        out_shape=jax.ShapeDtypeStruct((b_pad, three_e), jnp.float32),
        grid=(b_pad // tb,),
        in_specs=[pl.BlockSpec((tb, 4), lambda i: (i, 0)),
                  pl.BlockSpec((v_pad, three_e), lambda i: (0, 0))],  # resident
        out_specs=pl.BlockSpec((tb, three_e), lambda i: (i, 0)),
        compiler_params=pltpu.CompilerParams(
            dimension_semantics=("parallel",)),
    )(idx, combined)

    if b_pad != b:
        out = out[:b]
    return out


def cat_user_embedding(cat_ids, user_ids, hour_ids,
                       cat_tab, user_tab, hour_tab, *, tb=None):
    """Convenience wrapper: builds the combined table, then runs the kernel.

    cat_ids/user_ids/hour_ids: [B] int32 indices (x[1], x[2], x[3]).
    *_tab: [V+1, E] f32 embedding tables (pad row, i.e. last row, zeroed).
    Returns [B, 3*E] f32 = concat(cat_emb | user_emb | hour_emb).
    NOTE: like the torch module's forward, no bounds checking on indices.
    """
    combined, off_u, off_h = build_combined_table(cat_tab, user_tab, hour_tab)
    return cat_user_embedding_fused(cat_ids, user_ids, hour_ids,
                                    combined, off_u, off_h, tb=tb)


def _init_table(key, vocab, embed_size):
    """Deterministic nn.Embedding-style init; last row is padding_idx -> 0."""
    tab = jax.random.normal(key, (vocab + 1, embed_size), dtype=jnp.float32)
    return tab.at[vocab, :].set(0.0)


if __name__ == "__main__":
    # Small shapes consistent with the module.
    f_embed_size = 32
    vocab_size = {"cat": 12, "user": 6, "hour": 24}
    batch = 16

    key = jax.random.PRNGKey(0)
    k_cat, k_user, k_hour, k_i1, k_i2, k_i3 = jax.random.split(key, 6)

    cat_tab = _init_table(k_cat, vocab_size["cat"], f_embed_size)
    user_tab = _init_table(k_user, vocab_size["user"], f_embed_size)
    hour_tab = _init_table(k_hour, vocab_size["hour"], f_embed_size)

    # Indices in [0, V] inclusive so the padding index is also exercised.
    cat_ids = jax.random.randint(k_i1, (batch,), 0, vocab_size["cat"] + 1, jnp.int32)
    user_ids = jax.random.randint(k_i2, (batch,), 0, vocab_size["user"] + 1, jnp.int32)
    hour_ids = jax.random.randint(k_i3, (batch,), 0, vocab_size["hour"] + 1, jnp.int32)

    # Build the block-diagonal table once (hoisted), then run the kernel.
    combined, off_u, off_h = build_combined_table(cat_tab, user_tab, hour_tab)
    out = cat_user_embedding_fused(cat_ids, user_ids, hour_ids,
                                   combined, off_u, off_h)
    out = jax.block_until_ready(out)

    # Pure-JAX reference (torch semantics: gather rows, concat on dim 1).
    ref = jnp.concatenate([jnp.take(cat_tab, cat_ids, axis=0),
                           jnp.take(user_tab, user_ids, axis=0),
                           jnp.take(hour_tab, hour_ids, axis=0)], axis=1)

    assert out.shape == (batch, 3 * f_embed_size)
    assert out.dtype == jnp.float32
    assert jnp.allclose(out, ref, atol=1e-5, rtol=1e-5)
    print("KERNEL_OK")
</pallas_src>

<mosaic_0001>
module attributes {stable_mosaic.version = 11 : i64} {
  func.func @_fused_embed_concat_kernel(%arg0: i32, %arg1: memref<16x4xi32, #tpu.memory_space<vmem>>, %arg2: memref<128x96xf32, #tpu.memory_space<vmem>>, %arg3: memref<16x96xf32, #tpu.memory_space<vmem>>) attributes {dimension_semantics = [#tpu.dimension_semantics<parallel>], iteration_bounds = array<i64: 1>, scalar_prefetch = 0 : i64, scratch_operands = 0 : i64, tpu.core_type = #tpu.core_type<tc>, window_params = [{transform_indices = @transform_0, window_bounds = array<i64: 16, 4>}, {pipeline_mode = #tpu.pipeline_mode<synchronous>, transform_indices = @transform_1, window_bounds = array<i64: 128, 96>}, {transform_indices = @transform_2, window_bounds = array<i64: 16, 96>}]} {
    %c0 = arith.constant 0 : index
    %c0_0 = arith.constant 0 : index
    %0 = vector.load %arg1[%c0, %c0_0] : memref<16x4xi32, #tpu.memory_space<vmem>>, vector<16x4xi32>
    %1 = tpu.iota {dimensions = array<i32: 1>} : vector<16x128xi32>
    %2 = vector.extract_strided_slice %0 {offsets = [0, 0], sizes = [16, 1], strides = [1, 1]} : vector<16x4xi32> to vector<16x1xi32>
    %3 = vector.broadcast %2 : vector<16x1xi32> to vector<16x128xi32>
    %4 = arith.cmpi eq, %1, %3 : vector<16x128xi32>
    %5 = vector.extract_strided_slice %0 {offsets = [0, 1], sizes = [16, 1], strides = [1, 1]} : vector<16x4xi32> to vector<16x1xi32>
    %6 = vector.broadcast %5 : vector<16x1xi32> to vector<16x128xi32>
    %7 = arith.cmpi eq, %1, %6 : vector<16x128xi32>
    %8 = arith.ori %4, %7 : vector<16x128xi1>
    %9 = vector.extract_strided_slice %0 {offsets = [0, 2], sizes = [16, 1], strides = [1, 1]} : vector<16x4xi32> to vector<16x1xi32>
    %10 = vector.broadcast %9 : vector<16x1xi32> to vector<16x128xi32>
    %11 = arith.cmpi eq, %1, %10 : vector<16x128xi32>
    %12 = arith.ori %8, %11 : vector<16x128xi1>
    %13 = arith.extui %12 : vector<16x128xi1> to vector<16x128xi32>
    %14 = arith.sitofp %13 : vector<16x128xi32> to vector<16x128xf32>
    %c0_1 = arith.constant 0 : index
    %c0_2 = arith.constant 0 : index
    %15 = vector.load %arg2[%c0_1, %c0_2] : memref<128x96xf32, #tpu.memory_space<vmem>>, vector<128x96xf32>
    %cst = arith.constant dense<0.000000e+00> : vector<16x96xf32>
    %16 = tpu.matmul %14, %15, %cst {dimension_numbers = #tpu.dot_dimension_numbers<[1], [0], [0], [1], [0, 0, 1, 1], [], []>} : vector<16x128xf32>, vector<128x96xf32>, vector<16x96xf32> -> vector<16x96xf32>
    %c0_3 = arith.constant 0 : index
    %c0_4 = arith.constant 0 : index
    %17 = vector.load %arg3[%c0_3, %c0_4] : memref<16x96xf32, #tpu.memory_space<vmem>>, vector<16x96xf32>
    tpu.vector_store %arg3[%c0_3, %c0_4], %16 {strides = array<i32>} : memref<16x96xf32, #tpu.memory_space<vmem>>, vector<16x96xf32>,
    return
  }
  func.func @transform_0(%arg0: i32) -> (i32, i32) {
    %c0_i32 = arith.constant 0 : i32
    %c0_i32_0 = arith.constant 0 : i32
    return %arg0, %c0_i32 : i32, i32
  }
  func.func @transform_1(%arg0: i32) -> (i32, i32) {
    %c0_i32 = arith.constant 0 : i32
    %c0_i32_0 = arith.constant 0 : i32
    %c0_i32_1 = arith.constant 0 : i32
    return %c0_i32, %c0_i32_0 : i32, i32
  }
  func.func @transform_2(%arg0: i32) -> (i32, i32) {
    %c0_i32 = arith.constant 0 : i32
    %c0_i32_0 = arith.constant 0 : i32
    return %arg0, %c0_i32 : i32, i32
  }
}

</mosaic_0001>

<bundles_post_ra>
// kernel: tpu_custom_call.1
= control target key start
LH: loop header
LB: loop body
LE: loop exit
PB: predicated region body
PF: predicated region fallthrough
CT: control target
= control target key end

     0   :  { %v284_v3 = vmov 0   ;;  %s372_s0 = inlined_call_operand.vmem [shape: s32[16,4], index: 0, kind: input, shape index: {}]   ;;  %s373_s1 = inlined_call_operand.vmem [shape: f32[128,96], index: 1, kind: input, shape index: {}]   ;;  %s374_s2 = inlined_call_operand.hbm [shape: f32[16,96], index: 2, kind: output, shape index: {}]  }
   0x1   :  { %v13_v0 = vld [vmem:[%s372_s0 + $0x8] sm:$0xff]  ;;  %v12_v1 = vld [vmem:[%s372_s0] sm:$0xff]  ;;  %256 = vset.pattern.permute.xlu1 %v284_v3  ;;  %254 = vset.pattern.permute.xlu0 %v284_v3  ;;  %v50_v5 = vld [vmem:[%s373_s1 + $0x10] sm:$0xff] }
   0x2   :  { %v48_v2 = vld [vmem:[%s373_s1] sm:$0xff]  ;;  %v49_v4 = vld [vmem:[%s373_s1 + $0x8] sm:$0xff]  ;;  %v51_v6 = vld [vmem:[%s373_s1 + $0x18] sm:$0xff]  ;;  %20 = vperm.xlu1 %256, %v13_v0   ;;  %17 = vperm.xlu0 %254, %v12_v1  }
   0x3   :  { %v215_v7 = vpack.c.bf16 %v49_v4, %v48_v2  ;;  %v52_v8 = vld [vmem:[%s373_s1 + $0x20] sm:$0xff]  ;;  %v53_v9 = vld [vmem:[%s373_s1 + $0x28] sm:$0xff]  ;;  %v219_v10 = vpack.c.bf16 %v51_v6, %v50_v5 }
   0x5   :  { %216 = vmatprep.subr.bf16.mxu0 %v215_v7 }
   0x6   :  { %218 = vmatpush3.bf16.msra.mxu0 %v215_v7 }
   0x7   :  { %7 = vsyncpa [#allocation3], 0  ;;  %v285_v11 = vmov 1   ;;  %v223_v12 = vpack.c.bf16 %v53_v9, %v52_v8  ;;  %v54_v13 = vld [vmem:[%s373_s1 + $0x30] sm:$0xff]  ;;  %v55_v14 = vld [vmem:[%s373_s1 + $0x38] sm:$0xff]  ;;  %220 = vmatprep.subr.bf16.mxu0 %v219_v10  ;;  %v286_v16 = vmov 2   ;;  %v14_v31 = vlaneseq }
   0x8   :  { %257 = vset.pattern.permute.xlu1 %v285_v11  ;;  %255 = vset.pattern.permute.xlu0 %v285_v11  ;;  %v227_v15 = vpack.c.bf16 %v55_v14, %v54_v13  ;;  %v56_v17 = vld [vmem:[%s373_s1 + $0x40] sm:$0xff]  ;;  %v57_v18 = vld [vmem:[%s373_s1 + $0x48] sm:$0xff]  ;;  %v58_v20 = vld [vmem:[%s373_s1 + $0x50] sm:$0xff]  ;;  %v287_v37 = vmov 1.0   ;;  %vm139_vm10 = vcmask 785408  }
   0x9   :  { %28 = vperm.xlu1 %257, %v13_v0   ;;  %25 = vperm.xlu0 %255, %v12_v1   ;;  %v231_v19 = vpack.c.bf16 %v57_v18, %v56_v17  ;;  %v59_v21 = vld [vmem:[%s373_s1 + $0x58] sm:$0xff]  ;;  %v60_v23 = vld [vmem:[%s373_s1 + $0x60] sm:$0xff]  ;;  %v61_v24 = vld [vmem:[%s373_s1 + $0x68] sm:$0xff]  ;;  %v15_v32 = vand.u32 127, %v14_v31 }
   0xa   :  { %222 = vmatpush3.bf16.msra.mxu0 %v219_v10  ;;  %v235_v22 = vpack.c.bf16 %v59_v21, %v58_v20  ;;  %v239_v25 = vpack.c.bf16 %v61_v24, %v60_v23  ;;  %v62_v26 = vld [vmem:[%s373_s1 + $0x70] sm:$0xff]  ;;  %v63_v27 = vld [vmem:[%s373_s1 + $0x78] sm:$0xff]  ;;  %s288_s1 = smov [#allocation2]  }
   0xb   :  { %224 = vmatprep.subr.bf16.mxu0 %v223_v12  ;;  %v243_v28 = vpack.c.bf16 %v63_v27, %v62_v26  ;;  %s147_s16 = sshll.u32 %s288_s1, 4  ;;  %s148_s16 = int_to_ptr.vmem [resolvable:$true] %s147_s16 }
   0xc   :  { %s260_s17 = scalar_lea.vmem %s148_s16, 256  ;;  %p265_p1 = scmp.lt.s32.totalorder %s148_s16, %s148_s16 }
   0xd   :  { %258 = vset.pattern.permute.xlu1 %v286_v16  ;;  %259 = vset.pattern.permute.xlu0 %v286_v16  ;;  %p261_p0 = scmp.ne.s32.totalorder %s148_s16, %s260_s17  ;;  %p266_p2 = scmp.lt.s32.totalorder %s260_s17, %s260_s17 }
   0xe   :  { %35 = vperm.xlu1 %258, %v12_v1   ;;  %38 = vperm.xlu0 %259, %v13_v0  }
   0xf   :  { %226 = vmatpush3.bf16.msra.mxu0 %v223_v12  ;;  %p267_p3 = por %p266_p2, %p265_p1 }
  0x10   :  { %228 = vmatprep.subr.bf16.mxu0 %v227_v15 }
  0x11   :  { %p268_p4 = pnand %p267_p3, %p261_p0 }
  0x13   :  { %230 = vmatpush3.bf16.msra.mxu0 %v227_v15 }
  0x14   :  { %232 = vmatprep.subr.bf16.mxu0 %v231_v19 }
  0x17   :  { %234 = vmatpush3.bf16.msra.mxu0 %v231_v19 }
  0x18   :  { %236 = vmatprep.subr.bf16.mxu0 %v235_v22 }
  0x1b   :  { %238 = vmatpush3.bf16.msra.mxu0 %v235_v22 }
  0x1c   :  { %240 = vmatprep.subr.bf16.mxu0 %v239_v25 }
  0x1f   :  { %242 = vmatpush3.bf16.msra.mxu0 %v239_v25 }
  0x20   :  { %244 = vmatprep.subr.bf16.mxu0 %v243_v28 }
  0x23   :  { %246 = vmatpush3.bf16.msra.mxu0 %v243_v28 }
  0x81   :  { %v21_v29 = vpop.permute.xlu1 %20  ;;  %v18_v30 = vpop.permute.xlu0 %17 }
  0x82   :  { %vm23_vm2 = vcmp.eq.s32.totalorder %v15_v32, %v21_v29  ;;  %vm22_vm3 = vcmp.eq.s32.totalorder %v15_v32, %v18_v30 }
  0x88   :  { %v29_v33 = vpop.permute.xlu1 %28  ;;  %v26_v34 = vpop.permute.xlu0 %25 }
  0x89   :  { %vm31_vm0 = vcmp.eq.s32.totalorder %v15_v32, %v29_v33  ;;  %vm30_vm1 = vcmp.eq.s32.totalorder %v15_v32, %v26_v34 }
  0x8a   :  { %vm33_vm4 = vmor %vm23_vm2, %vm31_vm0 }
  0x8b   :  { %vm32_vm7 = vmor %vm22_vm3, %vm30_vm1 }
  0x8d   :  { %v36_v35 = vpop.permute.xlu1 %35  ;;  %v39_v36 = vpop.permute.xlu0 %38 }
  0x8e   :  { %vm40_vm5 = vcmp.eq.s32.totalorder %v15_v32, %v36_v35  ;;  %vm41_vm6 = vcmp.eq.s32.totalorder %v15_v32, %v39_v36 }
  0x8f   :  { %vm43_vm8 = vmor %vm33_vm4, %vm41_vm6 }
  0x90   :  { %vm42_vm9 = vmor %vm32_vm7, %vm40_vm5 }
  0x91   :  { %212 = vmatprep.mubr.msk.f32.mxu0 %vm42_vm9, %v287_v37 }
  0x92   :  { %213 = vmatmul.mubr.msk.f32.vlgmr.msra.gmra.mrb[0].mxu0 %vm43_vm8, %v287_v37 }
 0x165   :  { %v214_v38 = vpop.f32.mrb[0].mxu0 }
 0x166   :  { %141 = vst.msk [vmem:[#allocation2 + $0x8] sm:$0xff] %vm139_vm10, %v214_v38  ;;  %v130_v39 = vpop.f32.mrb[1].mxu0 }
 0x167   :  { %140 = vst.msk [vmem:[#allocation2] sm:$0xff] %vm139_vm10, %v130_v39 }
 0x168   :  { %271 = shalt.err (!%p268_p4)
}
 0x169   :  { %s272_s20 = scalar_lea.hbm %s374_s2, 256 }
 0x16a   :  { %p273_p5 = scmp.ne.s32.totalorder %s374_s2, %s272_s20  ;;  %p276_p6 = scmp.lt.u32.totalorder %s272_s20, %s374_s2 }
 0x16c   :  { %p278_p7 = pnand %p276_p6, %p273_p5 }
 0x16e   :  { %281 = shalt.err (!%p278_p7)
}
 0x16f   :  { %s289_s24 = smov 128   ;;  %s290_s25 = smov 8  }
 0x170   :  { %153 = dma.vmem_to_hbm [thread:$0]  %s148_s16, 256, %s374_s2, [#allocation3], %s289_s24, %s289_s24, %s290_s25  }
 0x171   :  { %282 = dma.done.wait [#allocation3], 256  }
 0x172   :  { %283 = vsyncadd [#allocation3], 4294967040 }
 0x173   :  { %157 = vsyncpa [#allocation3], 1 }

</bundles_post_ra>
